<compile_context>
chip_gen: v7x
topology: tpu7x:2x2x1
jax: 0.10.0
libtpu: 0.0.40
codegen_flags: <defaults>
</compile_context>

<pallas_src>
import jax
import jax.numpy as jnp
from jax.experimental import pallas as pl
from jax.experimental.pallas import tpu as pltpu

_LANE = 128


def _mlp_turns_kernel(xT_ref, w1T_ref, b1_ref, w2T_ref, b2_ref, w3T_ref, b3_ref,
                      outT_ref):
    """One lane-dense batch tile per grid step; all parameters VMEM-resident."""
    xT = xT_ref[...]                                                 # (Din, TB)

    # fc1 -> relu           (BatchNorm1 folded into fc2 on the host)
    h = jnp.dot(w1T_ref[...], xT,
                preferred_element_type=jnp.float32) + b1_ref[...]    # (Dh, TB)
    h = jnp.maximum(h, 0.0)
    # TODO(synk): nn.Dropout is identity in inference; stochastic masking not emitted.

    # fc2 (+ folded BN1) -> relu   (BatchNorm2 folded into fc3 on the host)
    h = jnp.dot(w2T_ref[...], h,
                preferred_element_type=jnp.float32) + b2_ref[...]    # (Dh/2, TB)
    h = jnp.maximum(h, 0.0)

    # fc3 (+ folded BN2) -> log_softmax over classes (sublane axis)
    logits = jnp.dot(w3T_ref[...], h,
                     preferred_element_type=jnp.float32) + b3_ref[...]   # (C, TB)
    m = jnp.max(logits, axis=0, keepdims=True)
    z = logits - m
    lse = jnp.log(jnp.sum(jnp.exp(z), axis=0, keepdims=True))
    outT_ref[...] = (z - lse).astype(outT_ref.dtype)


def _pick_batch_tile(B, block_b):
    """Lane-axis batch tile: multiple of 128, >=2 grid steps whenever B allows."""
    if B <= _LANE:
        return B                                   # single block (== full array dim)
    cap = max(_LANE, (block_b // _LANE) * _LANE)
    half = ((B + 1) // 2 + _LANE - 1) // _LANE * _LANE   # ceil(B/2), lane multiple
    return max(_LANE, min(cap, half))


def mlp_turns_forward(x, params, *, eps=1e-5, block_b=4096):
    """Pallas TPU implementation of MLP_Turns.forward (inference mode)."""
    B, D_inp = x.shape
    w1, w2, w3 = params["w1"], params["w2"], params["w3"]
    D_hid, D_hid2, n_classes = w1.shape[1], w2.shape[1], w3.shape[1]
    f32 = jnp.float32

    # ---- Host-side constant folding --------------------------------------
    # BatchNorm (running stats + affine, eval) -> per-feature scale/shift,
    # folded into the *next* linear layer (exact: relu precedes the fold point,
    # dropout is identity in eval).
    s1 = params["g1"].astype(f32) / jnp.sqrt(params["v1"].astype(f32) + eps)
    t1 = params["be1"].astype(f32) - params["m1"].astype(f32) * s1
    s2 = params["g2"].astype(f32) / jnp.sqrt(params["v2"].astype(f32) + eps)
    t2 = params["be2"].astype(f32) - params["m2"].astype(f32) * s2

    w2f = (s1[:, None] * w2.astype(f32)).astype(w2.dtype)            # (Dh, Dh/2)
    b2f = t1 @ w2.astype(f32) + params["b2"].astype(f32)             # (Dh/2,)
    w3f = (s2[:, None] * w3.astype(f32)).astype(w3.dtype)            # (Dh/2, C)
    b3f = t2 @ w3.astype(f32) + params["b3"].astype(f32)             # (C,)

    # Transposed layout: batch on the lane axis -> lane-dense everywhere.
    xT = x.T                                                         # (Din, B)
    col = lambda v: v.astype(f32).reshape(-1, 1)                     # feature column
    args = (
        xT,                                 # native dtype; MXU consumes it directly
        w1.T, col(params["b1"]),
        w2f.T, col(b2f),
        w3f.T, col(b3f),
    )

    TB = _pick_batch_tile(B, block_b)
    grid = (pl.cdiv(B, TB),)                # no jnp.pad: partial last block is masked

    const_spec = lambda a: pl.BlockSpec(a.shape, lambda i: (0, 0))

    flops = 2 * B * (D_inp * D_hid + D_hid * D_hid2 + D_hid2 * n_classes)
    bytes_accessed = int(sum(int(a.size) * a.dtype.itemsize for a in args)
                         + B * n_classes * 4)
    cost = pl.CostEstimate(flops=int(flops),
                           transcendentals=int(2 * B * n_classes),
                           bytes_accessed=bytes_accessed)

    outT = pl.pallas_call(
        _mlp_turns_kernel,
        out_shape=jax.ShapeDtypeStruct((n_classes, B), f32),
        grid=grid,
        in_specs=[pl.BlockSpec((D_inp, TB), lambda i: (0, i))]
                 + [const_spec(a) for a in args[1:]],
        out_specs=pl.BlockSpec((n_classes, TB), lambda i: (0, i)),
        compiler_params=pltpu.CompilerParams(
            dimension_semantics=("parallel",)),
        cost_estimate=cost,
    )(*args)
    return outT.T                                                    # (B, C)


def _reference(x, params, eps=1e-5):
    """Pure-JAX reference mirroring the PyTorch forward (eval mode)."""
    h = jnp.maximum(x @ params["w1"] + params["b1"], 0.0)
    h = (h - params["m1"]) / jnp.sqrt(params["v1"] + eps) * params["g1"] + params["be1"]
    h = jnp.maximum(h @ params["w2"] + params["b2"], 0.0)
    h = (h - params["m2"]) / jnp.sqrt(params["v2"] + eps) * params["g2"] + params["be2"]
    logits = h @ params["w3"] + params["b3"]
    return jax.nn.log_softmax(logits, axis=1)


if __name__ == "__main__":
    B, D_inp, D_hid, n_classes = 300, 32, 32, 2
    D_hid2 = D_hid // 2

    key = jax.random.PRNGKey(0)
    ks = jax.random.split(key, 15)
    init = lambda k, shape, s=0.1: s * jax.random.normal(k, shape, dtype=jnp.float32)

    params = {
        # fc1 / fc2 / fc3 weights stored as (in, out) = W.T of the PyTorch layer
        "w1": init(ks[0], (D_inp, D_hid)),
        "b1": init(ks[1], (D_hid,)),
        "w2": init(ks[2], (D_hid, D_hid2)),
        "b2": init(ks[3], (D_hid2,)),
        "w3": init(ks[4], (D_hid2, n_classes)),
        "b3": init(ks[5], (n_classes,)),
        # BatchNorm1d(D_hid): gamma/beta + running mean/var (inference)
        "g1": 1.0 + init(ks[6], (D_hid,)),
        "be1": init(ks[7], (D_hid,)),
        "m1": init(ks[8], (D_hid,)),
        "v1": 1.0 + jnp.abs(init(ks[9], (D_hid,))),
        # BatchNorm1d(D_hid // 2)
        "g2": 1.0 + init(ks[10], (D_hid2,)),
        "be2": init(ks[11], (D_hid2,)),
        "m2": init(ks[12], (D_hid2,)),
        "v2": 1.0 + jnp.abs(init(ks[13], (D_hid2,))),
    }
    x = jax.random.normal(ks[14], (B, D_inp), dtype=jnp.float32)

    # B=300 with the default tile -> TB=256, grid=(2,): exercises megacore
    # splitting plus the masked partial last block (no host-side padding).
    out = mlp_turns_forward(x, params)
    out = jax.block_until_ready(out)

    ref = _reference(x, params)
    assert out.shape == (B, n_classes), out.shape
    assert jnp.allclose(out, ref, rtol=1e-4, atol=1e-4), \
        float(jnp.max(jnp.abs(out - ref)))

    print("KERNEL_OK")
</pallas_src>

<mosaic_0001>
module attributes {stable_mosaic.version = 11 : i64} {
  func.func @_mlp_turns_kernel(%arg0: i32, %arg1: memref<32x256xf32, #tpu.memory_space<vmem>>, %arg2: memref<32x32xf32, #tpu.memory_space<vmem>>, %arg3: memref<32x1xf32, #tpu.memory_space<vmem>>, %arg4: memref<16x32xf32, #tpu.memory_space<vmem>>, %arg5: memref<16x1xf32, #tpu.memory_space<vmem>>, %arg6: memref<2x16xf32, #tpu.memory_space<vmem>>, %arg7: memref<2x1xf32, #tpu.memory_space<vmem>>, %arg8: memref<2x256xf32, #tpu.memory_space<vmem>>) attributes {dimension_semantics = [#tpu.dimension_semantics<parallel>], iteration_bounds = array<i64: 2>, scalar_prefetch = 0 : i64, scratch_operands = 0 : i64, tpu.core_type = #tpu.core_type<tc>, window_params = [{transform_indices = @transform_0, window_bounds = array<i64: 32, 256>}, {pipeline_mode = #tpu.pipeline_mode<synchronous>, transform_indices = @transform_1, window_bounds = array<i64: 32, 32>}, {pipeline_mode = #tpu.pipeline_mode<synchronous>, transform_indices = @transform_2, window_bounds = array<i64: 32, 1>}, {pipeline_mode = #tpu.pipeline_mode<synchronous>, transform_indices = @transform_3, window_bounds = array<i64: 16, 32>}, {pipeline_mode = #tpu.pipeline_mode<synchronous>, transform_indices = @transform_4, window_bounds = array<i64: 16, 1>}, {pipeline_mode = #tpu.pipeline_mode<synchronous>, transform_indices = @transform_5, window_bounds = array<i64: 2, 16>}, {pipeline_mode = #tpu.pipeline_mode<synchronous>, transform_indices = @transform_6, window_bounds = array<i64: 2, 1>}, {transform_indices = @transform_7, window_bounds = array<i64: 2, 256>}]} {
    %c0 = arith.constant 0 : index
    %c0_0 = arith.constant 0 : index
    %0 = vector.load %arg1[%c0, %c0_0] : memref<32x256xf32, #tpu.memory_space<vmem>>, vector<32x256xf32>
    %c0_1 = arith.constant 0 : index
    %c0_2 = arith.constant 0 : index
    %1 = vector.load %arg2[%c0_1, %c0_2] : memref<32x32xf32, #tpu.memory_space<vmem>>, vector<32x32xf32>
    %cst = arith.constant dense<0.000000e+00> : vector<32x256xf32>
    %2 = tpu.matmul %1, %0, %cst {dimension_numbers = #tpu.dot_dimension_numbers<[1], [0], [0], [1], [0, 0, 1, 1], [], []>} : vector<32x32xf32>, vector<32x256xf32>, vector<32x256xf32> -> vector<32x256xf32>
    %c0_3 = arith.constant 0 : index
    %c0_4 = arith.constant 0 : index
    %3 = vector.load %arg3[%c0_3, %c0_4] : memref<32x1xf32, #tpu.memory_space<vmem>>, vector<32x1xf32>
    %4 = vector.broadcast %3 : vector<32x1xf32> to vector<32x256xf32>
    %5 = arith.addf %2, %4 : vector<32x256xf32>
    %cst_5 = arith.constant 0.000000e+00 : f32
    %6 = vector.broadcast %cst_5 : f32 to vector<32x256xf32>
    %7 = arith.maximumf %5, %6 : vector<32x256xf32>
    %c0_6 = arith.constant 0 : index
    %c0_7 = arith.constant 0 : index
    %8 = vector.load %arg4[%c0_6, %c0_7] : memref<16x32xf32, #tpu.memory_space<vmem>>, vector<16x32xf32>
    %cst_8 = arith.constant dense<0.000000e+00> : vector<16x256xf32>
    %9 = tpu.matmul %8, %7, %cst_8 {dimension_numbers = #tpu.dot_dimension_numbers<[1], [0], [0], [1], [0, 0, 1, 1], [], []>} : vector<16x32xf32>, vector<32x256xf32>, vector<16x256xf32> -> vector<16x256xf32>
    %c0_9 = arith.constant 0 : index
    %c0_10 = arith.constant 0 : index
    %10 = vector.load %arg5[%c0_9, %c0_10] : memref<16x1xf32, #tpu.memory_space<vmem>>, vector<16x1xf32>
    %11 = vector.broadcast %10 : vector<16x1xf32> to vector<16x256xf32>
    %12 = arith.addf %9, %11 : vector<16x256xf32>
    %cst_11 = arith.constant 0.000000e+00 : f32
    %13 = vector.broadcast %cst_11 : f32 to vector<16x256xf32>
    %14 = arith.maximumf %12, %13 : vector<16x256xf32>
    %c0_12 = arith.constant 0 : index
    %c0_13 = arith.constant 0 : index
    %15 = vector.load %arg6[%c0_12, %c0_13] : memref<2x16xf32, #tpu.memory_space<vmem>>, vector<2x16xf32>
    %cst_14 = arith.constant dense<0.000000e+00> : vector<2x256xf32>
    %16 = tpu.matmul %15, %14, %cst_14 {dimension_numbers = #tpu.dot_dimension_numbers<[1], [0], [0], [1], [0, 0, 1, 1], [], []>} : vector<2x16xf32>, vector<16x256xf32>, vector<2x256xf32> -> vector<2x256xf32>
    %c0_15 = arith.constant 0 : index
    %c0_16 = arith.constant 0 : index
    %17 = vector.load %arg7[%c0_15, %c0_16] : memref<2x1xf32, #tpu.memory_space<vmem>>, vector<2x1xf32>
    %18 = vector.broadcast %17 : vector<2x1xf32> to vector<2x256xf32>
    %19 = arith.addf %16, %18 : vector<2x256xf32>
    %cst_17 = arith.constant dense<0xFF800000> : vector<256xf32>
    %20 = vector.multi_reduction <maximumf>, %19, %cst_17 [0] : vector<2x256xf32> to vector<256xf32>
    %21 = vector.shape_cast %20 : vector<256xf32> to vector<1x256xf32>
    %22 = vector.broadcast %21 : vector<1x256xf32> to vector<2x256xf32>
    %23 = arith.subf %19, %22 : vector<2x256xf32>
    %24 = math.exp %23 : vector<2x256xf32>
    %cst_18 = arith.constant dense<0.000000e+00> : vector<256xf32>
    %25 = vector.multi_reduction <add>, %24, %cst_18 [0] : vector<2x256xf32> to vector<256xf32>
    %26 = vector.shape_cast %25 : vector<256xf32> to vector<1x256xf32>
    %27 = math.log %26 : vector<1x256xf32>
    %28 = vector.broadcast %27 : vector<1x256xf32> to vector<2x256xf32>
    %29 = arith.subf %23, %28 : vector<2x256xf32>
    %c0_19 = arith.constant 0 : index
    %c0_20 = arith.constant 0 : index
    %30 = vector.load %arg8[%c0_19, %c0_20] : memref<2x256xf32, #tpu.memory_space<vmem>>, vector<2x256xf32>
    tpu.vector_store %arg8[%c0_19, %c0_20], %29 {strides = array<i32>} : memref<2x256xf32, #tpu.memory_space<vmem>>, vector<2x256xf32>,
    return
  }
  func.func @transform_0(%arg0: i32) -> (i32, i32) {
    %c0_i32 = arith.constant 0 : i32
    %c0_i32_0 = arith.constant 0 : i32
    return %c0_i32, %arg0 : i32, i32
  }
  func.func @transform_1(%arg0: i32) -> (i32, i32) {
    %c0_i32 = arith.constant 0 : i32
    %c0_i32_0 = arith.constant 0 : i32
    %c0_i32_1 = arith.constant 0 : i32
    return %c0_i32, %c0_i32_0 : i32, i32
  }
  func.func @transform_2(%arg0: i32) -> (i32, i32) {
    %c0_i32 = arith.constant 0 : i32
    %c0_i32_0 = arith.constant 0 : i32
    %c0_i32_1 = arith.constant 0 : i32
    return %c0_i32, %c0_i32_0 : i32, i32
  }
  func.func @transform_3(%arg0: i32) -> (i32, i32) {
    %c0_i32 = arith.constant 0 : i32
    %c0_i32_0 = arith.constant 0 : i32
    %c0_i32_1 = arith.constant 0 : i32
    return %c0_i32, %c0_i32_0 : i32, i32
  }
  func.func @transform_4(%arg0: i32) -> (i32, i32) {
    %c0_i32 = arith.constant 0 : i32
    %c0_i32_0 = arith.constant 0 : i32
    %c0_i32_1 = arith.constant 0 : i32
    return %c0_i32, %c0_i32_0 : i32, i32
  }
  func.func @transform_5(%arg0: i32) -> (i32, i32) {
    %c0_i32 = arith.constant 0 : i32
    %c0_i32_0 = arith.constant 0 : i32
    %c0_i32_1 = arith.constant 0 : i32
    return %c0_i32, %c0_i32_0 : i32, i32
  }
  func.func @transform_6(%arg0: i32) -> (i32, i32) {
    %c0_i32 = arith.constant 0 : i32
    %c0_i32_0 = arith.constant 0 : i32
    %c0_i32_1 = arith.constant 0 : i32
    return %c0_i32, %c0_i32_0 : i32, i32
  }
  func.func @transform_7(%arg0: i32) -> (i32, i32) {
    %c0_i32 = arith.constant 0 : i32
    %c0_i32_0 = arith.constant 0 : i32
    return %c0_i32, %arg0 : i32, i32
  }
}

</mosaic_0001>

<bundles_post_ra>
// kernel: tpu_custom_call.1
= control target key start
LH: loop header
LB: loop body
LE: loop exit
PB: predicated region body
PF: predicated region fallthrough
CT: control target
= control target key end

     0   :  { %12 = vsyncpa [#allocation3], 0  ;;  %s1267_s0 = inlined_call_operand.hbm [shape: f32[32,300], index: 0, kind: input, shape index: {}]   ;;  %s1268_s1 = inlined_call_operand.vmem [shape: f32[32,32], index: 1, kind: input, shape index: {}]   ;;  %s1269_s2 = inlined_call_operand.vmem [shape: f32[32,1], index: 2, kind: input, shape index: {}]   ;;  %s1270_s3 = inlined_call_operand.vmem [shape: f32[16,32], index: 3, kind: input, shape index: {}]   ;;  %s1271_s4 = inlined_call_operand.vmem [shape: f32[16,1], index: 4, kind: input, shape index: {}]   ;;  %s1272_s5 = inlined_call_operand.vmem [shape: f32[2,16], index: 5, kind: input, shape index: {}]   ;;  %s1273_s6 = inlined_call_operand.vmem [shape: f32[2,1], index: 6, kind: input, shape index: {}]   ;;  %s1274_s7 = inlined_call_operand.hbm [shape: f32[2,300], index: 7, kind: output, shape index: {}]  }
   0x1   :  { %14 = vsyncpa [#allocation3 + $0x1], 0 }
   0x2   :  { %15 = vsyncpa [#allocation4], 0 }
   0x3   :  { %17 = vsyncpa [#allocation4 + $0x1], 0  ;;  %s1037_s24 = smov 0   ;;  %s1039_s25 = smov 0  }
   0x4   :  { %s1041_s26 = smov 0   ;;  %s1043_s27 = smov 0  }
   0x5 LB: > { %s1058_s28 = sadd.s32 4294967295, %s989_s27   ;;  %s787_s29 = sadd.s32 4294967294, %s989_s27   ;;  %s989_s27 = sphi %s1043_s27, %s1286_s27   ;;  %s985_s26 = sphi %s1041_s26, %s1285_s26   ;;  %s981_s25 = sphi %s1039_s25, %s1284_s25   ;;  %s977_s24 = sphi %s1037_s24, %s1283_s24  }
   0x6   : > { %s1062_s30 = sadd.s32 1, %s989_s27   ;;  %s30_s8 = sadd.s32 1, %s985_s26 }
   0x7   : > { %s27_s9 = ssub.s32 %s989_s27, %s1062_s30  ;;  %p37_p0 = scmp.ne.s32.totalorder %s985_s26, %s981_s25 }
   0x8   : > { %p28_p1 = scmp.eq.s32.totalorder %s27_s9, 0  ;;  %p38_p2 = scmp.eq.s32.totalorder %s989_s27, 0 }
   0x9   : > { %p43_p3 = scmp.ne.s32.totalorder %s981_s25, %s977_s24  ;;  %p44_p4 = scmp.eq.s32.totalorder %s1058_s28, 0 }
   0xa   : > { %s1074_s10 = scalar_select %p28_p1, %s985_s26, %s30_s8  }
   0xb   : > { %p39_p5 = por %p38_p2, %p37_p0  ;;  %p1076_p6 = por %p44_p4, %p43_p3 }
   0xc   : > { %1276 = sst [smem:[#allocation8_spill]] %s1074_s10  ;;  %p193_p7 = scmp.eq.s32.totalorder %s1058_s28, 1 }
   0xd   : > { %p199_p8 = scmp.eq.s32.totalorder %s787_s29, 1  ;;  %p1275_p11 = scmp.ge.s32.totalorder %s989_s27, 2 }
   0xe   : > { %p1081_p9 = por %p193_p7, %p37_p0 }
   0xf   : > { %p1085_p10 = por %p199_p8, %p43_p3  ;;  %233 = sbr.rel (%p1275_p11) target bundleno = 57 (0x39), region = 40 }
  0x11   : > { %s1279_s13 = scalar_select %p1085_p10, 1, 0 }
  0x16   : > { %236 = sbr.rel (!%p39_p5) target bundleno = 57 (0x39), region = 44  ;;  %s237_s14 = sand.u32 (%p39_p5), 1, %s985_s26  }
  0x17   : > { %s791_s15 = sshll.u32 (%p39_p5), %s989_s27, 1  ;;  %s790_s16 = sshll.u32 (%p39_p5), %s237_s14, 6 }
  0x18   : > { %s243_s17 = ssub.s32 (%p39_p5), 3, %s791_s15  ;;  %s1100_s20 = scalar_lea.sflag (%p39_p5), [#allocation3], %s237_s14 }
  0x19   : > { %p244_p12 = scmp.lt.s32.totalorder (%p39_p5), %s243_s17, 2  ;;  %s241_s21 = scalar_lea.vmem (%p39_p5), [#allocation2], %s790_s16 }
  0x1d   : > { %s1288_s17 = smov (!%p244_p12, %s243_s17), 2 }
  0x1e   : > { %s1097_s18 = sshll.u32 %s1288_s17, 9 }
  0x1f   : > { %s248_s19 = ssub.s32 1024, %s1097_s18 }
  0x20   : > { %249 = vsyncadd %s1100_s20, %s248_s19  ;;  %p793_p13 = scmp.ne.s32.totalorder %s1097_s18, 0  ;;  %s818_s22 = sshll.u32 %s989_s27, 8 }
  0x21   : > { %s1108_s8 = scalar_lea.hbm %s1267_s0, %s818_s22  ;;  %s795_s9 = sshll.u32 %s1288_s17, 3 }
  0x22   : > { %s255_s14 = sshll.u32 %s241_s21, 4  ;;  %s895_s15 = scalar_lea.hbm %s1108_s8, %s1097_s18  ;;  %s1111_s14 = int_to_ptr.vmem [resolvable:$true] %s255_s14 }
  0x23   : > { %p896_p0 = scmp.ne.s32.totalorder %s1108_s8, %s895_s15  ;;  %s899_s10 = scalar_lea.hbm %s1267_s0, 1536 }
  0x24   : > { %p900_p3 = scmp.lt.u32.totalorder %s1108_s8, %s1267_s0  ;;  %p901_p4 = scmp.lt.u32.totalorder %s899_s10, %s895_s15 }
  0x25   : > { %p897_p1 = pnand %p896_p0, %p793_p13  ;;  %p903_p7 = scmp.lt.u32.totalorder %s895_s15, %s1108_s8 }
  0x26   : > { %p902_p5 = por %p901_p4, %p900_p3 }
  0x27   : > { %p898_p2 = pneg %p897_p1 }
  0x28   : > { %p904_p8 = por %p903_p7, %p902_p5 }
  0x2a   : > { %p905_p12 = pnand %p904_p8, %p898_p2 }
  0x2c   : > { %908 = shalt.err (!%p905_p12)
}
  0x2d   : > { %s909_s21 = scalar_lea.vmem %s1111_s14, %s1097_s18  ;;  %s991_s29 = smov [#allocation2]  }
  0x2e   : > { %p910_p0 = scmp.ne.s32.totalorder %s1111_s14, %s909_s21  ;;  %s913_s16 = sshll.u32 %s991_s29, 4  ;;  %s914_s16 = int_to_ptr.vmem [resolvable:$false] %s913_s16 }
  0x2f   : > { %s915_s19 = scalar_lea.vmem %s914_s16, 2048  ;;  %p916_p10 = scmp.lt.s32.totalorder %s1111_s14, %s914_s16 }
  0x30   : > { %p911_p1 = pnand %p910_p0, %p793_p13  ;;  %p917_p3 = scmp.lt.s32.totalorder %s915_s19, %s909_s21 }
  0x32   : > { %p912_p11 = pneg %p911_p1  ;;  %p918_p4 = por %p917_p3, %p916_p10 }
  0x34   : > { %p919_p5 = pnand %p918_p4, %p912_p11 }
  0x36   : > { %922 = shalt.err (!%p919_p5)
}
  0x37   : > { %s992_s10 = smov 384   ;;  %s993_s15 = smov 256  }
  0x38   : > { %261 = dma.hbm_to_vmem [thread:$0]  (%p793_p13), %s1108_s8, %s1097_s18, %s1111_s14, %s1100_s20, %s992_s10, %s993_s15, %s795_s9  }
  0x39 PF: > { %p798_p2 = scmp.ge.s32.totalorder %s989_s27, 1  ;;  %p263_p7 = scmp.lt.s32.totalorder %s989_s27, 3 }
  0x3b   : > { %p264_p10 = pnand %p798_p2, %p263_p7 }
  0x3c   : > { %s1143_s23 = sand.u32 (!%p264_p10), 1, %s981_s25  }
  0x3d   : > { %267 = sbr.rel (%p264_p10) target bundleno = 843 (0x34b), region = 48  ;;  %s799_s22 = sshll.u32 (!%p264_p10), %s1143_s23, 6 }
  0x3e   : > { %s270_s21 = scalar_lea.sflag (!%p264_p10), [#allocation3], %s1143_s23  ;;  %s273_s29 = scalar_lea.vmem (!%p264_p10), [#allocation2], %s799_s22 }
  0x44   : > { %968 = dma.done.wait (%p1076_p6), %s270_s21, 1024  }
  0x45   : > { %970 = vsyncadd (%p1076_p6), %s270_s21, 4294966272  ;;  %v994_v0 = vmov 0.0   ;;  %v995_v1 = vmov 0   ;;  %v315_v2 = vld [vmem:[%s273_s29 + $0x8] sm:$0xff]  ;;  %v317_v3 = vld [vmem:[%s273_s29 + $0x18] sm:$0xff]  ;;  %vm350_vm0 = vcmask 261120  }
  0x46   : > { %427 = vmatprep.mubr.f32.mxu0 %v994_v0  ;;  %885 = vset.pattern.permute.xlu0 %v995_v1  ;;  %v314_v4 = vld [vmem:[%s273_s29] sm:$0xff]  ;;  %v822_v5 = vpack.c.bf16 %v317_v3, %v315_v2  ;;  %v316_v6 = vld [vmem:[%s273_s29 + $0x10] sm:$0xff]  ;;  %v319_v7 = vld [vmem:[%s273_s29 + $0x28] sm:$0xff]  ;;  %vm568_vm1 = vcmask 130048   ;;  %vm643_vm2 = vcmask 1041408   ;;  %s800_s11 = sshll.u32 %s1143_s23, 2 }
  0x47   : > { %886 = vset.pattern.permute.xlu1 %v995_v1  ;;  %544 = vmatprep.mubr.f32.mxu1 %v994_v0  ;;  %v321_v8 = vld [vmem:[%s273_s29 + $0x38] sm:$0xff]  ;;  %v824_v9 = vpack.c.bf16 %v316_v6, %v314_v4  ;;  %v318_v11 = vld [vmem:[%s273_s29 + $0x20] sm:$0xff]  ;;  %v320_v12 = vld [vmem:[%s273_s29 + $0x30] sm:$0xff]  ;;  %s303_s17 = scalar_lea.vmem [#allocation5], %s800_s11  ;;  %s697_s18 = scalar_lea.sflag [#allocation4], %s1143_s23 }
  0x48   : > { %v826_v10 = vpack.c.bf16 %v321_v8, %v319_v7  ;;  %823 = vmatprep.subr.bf16.mxu0 %v822_v5  ;;  %v828_v13 = vpack.c.bf16 %v320_v12, %v318_v11  ;;  %v326_v14 = vld [vmem:[%s1269_s2] sm:$0xff]  ;;  %v328_v15 = vld [vmem:[%s1269_s2 + $0x10] sm:$0xff]  ;;  %v327_v16 = vld [vmem:[%s1269_s2 + $0x8] sm:$0xff]  ;;  %s810_s20 = sshll.u32 (%p1081_p9), %s1058_s28, 1 }
  0x49   : > { %825 = vmatpush1.bf16.msra.mxu0 %v824_v9  ;;  %332 = vperm.xlu0 %885, %v326_v14   ;;  %v329_v17 = vld [vmem:[%s1269_s2 + $0x18] sm:$0xff]  ;;  %v322_v18 = vld [vmem:[%s1268_s1] sm:$0xff]  ;;  %v463_v20 = vld [vmem:[%s1271_s4 + $0x8] sm:$0xff]  ;;  %s705_s8 = ssub.s32 (%p1081_p9), 3, %s810_s20 }
  0x4a   : > { %827 = vmatprep.subr.bf16.mxu0 %v826_v10  ;;  %342 = vperm.xlu1 %886, %v328_v15   ;;  %v462_v19 = vld [vmem:[%s1271_s4] sm:$0xff]  ;;  %v323_v21 = vld [vmem:[%s1268_s1 + $0x8] sm:$0xff]  ;;  %v324_v23 = vld [vmem:[%s1268_s1 + $0x10] sm:$0xff]  ;;  %p706_p6 = scmp.lt.s32.totalorder (%p1081_p9), %s705_s8, 2 }
  0x4b   : > { %v562_v22 = vld [vmem:[%s1273_s6] sm:$0x3]  ;;  %v325_v24 = vld [vmem:[%s1268_s1 + $0x18] sm:$0xff]  ;;  %v461_v58 = vld [vmem:[%s1270_s3 + $0x8] sm:$0xff] }
  0x4c   : > { %v460_v57 = vld [vmem:[%s1270_s3] sm:$0xff] }
  0x4d   : > { %829 = vmatpush1.bf16.msra.mxu0 %v828_v13  ;;  %337 = vperm.xlu0 %885, %v327_v16  }
  0x4e   : > { %347 = vperm.xlu1 %886, %v329_v17  }
  0x50   : > { %801 = vmatmul.mubr.msk.f32.vlgmr.msra.gmra.mrb[0].mxu0 %vm350_vm0, %v322_v18 }
  0x51   : > { %433 = vmatprep.mubr.f32.mxu0 %v994_v0  ;;  %466 = vperm.xlu0 %885, %v462_v19  }
  0x52   : > { %471 = vperm.xlu1 %886, %v463_v20  }
  0x54   : > { %802 = vmatmul.mubr.msk.f32.gmra.mrb[2].mxu0 %vm350_vm0, %v323_v21 }
  0x55   : > { %439 = vmatprep.mubr.f32.mxu0 %v994_v0  ;;  %565 = vperm.xlu0 %885, %v562_v22  }
  0x58   : > { %803 = vmatmul.mubr.msk.f32.gmra.mrb[4].mxu0 %vm350_vm0, %v324_v23 }
  0x59   : > { %445 = vmatprep.mubr.f32.mxu0 %v994_v0 }
  0x5c   : > { %804 = vmatmul.mubr.msk.f32.gmra.mrb[6].mxu0 %vm350_vm0, %v325_v24 }
  0xc8   : > { %v333_v25 = vpop.permute.xlu0 %332 }
  0xc9   : > { %v343_v34 = vpop.permute.xlu1 %342 }
  0xcc   : > { %v338_v29 = vpop.permute.xlu0 %337 }
  0xcd   : > { %v348_v45 = vpop.permute.xlu1 %347 }
  0xd0   : > { %v467_v61 = vpop.permute.xlu0 %466 }
  0xd1   : > { %v472_v63 = vpop.permute.xlu1 %471 }
  0xd4   : > { %v566_v12 = vpop.permute.xlu0 %565 }
 0x123   : > { %v429_v26 = vpop.f32.mrb[0].mxu0 }
 0x124   : > { %v431_v27 = vpop.f32.mrb[1].mxu0  ;;  %v430_v28 = vadd.f32 %v429_v26, %v333_v25 }
 0x125   : > { %v432_v30 = vadd.f32 %v431_v27, %v333_v25 }
 0x126   : > { %v452_v36 = vmax.f32 %v430_v28, 0.0 }
 0x127   : > { %v435_v31 = vpop.f32.mrb[2].mxu0  ;;  %v453_v38 = vmax.f32 %v432_v30, 0.0 }
 0x128   : > { %v436_v32 = vadd.f32 %v435_v31, %v338_v29  ;;  %v437_v33 = vpop.f32.mrb[3].mxu0 }
 0x129   : > { %v438_v35 = vadd.f32 %v437_v33, %v338_v29 }
 0x12a   : > { %v454_v37 = vmax.f32 %v436_v32, 0.0 }
 0x12b   : > { %v455_v39 = vmax.f32 %v438_v35, 0.0  ;;  %v441_v40 = vpop.f32.mrb[4].mxu0 }
 0x12c   : > { %v443_v41 = vpop.f32.mrb[5].mxu0  ;;  %v832_v42 = vpack.c.bf16 %v454_v37, %v452_v36  ;;  %v442_v44 = vadd.f32 %v441_v40, %v343_v34 }
 0x12d   : > { %v830_v43 = vpack.c.bf16 %v455_v39, %v453_v38  ;;  %v444_v46 = vadd.f32 %v443_v41, %v343_v34 }
 0x12e   : > { %v456_v51 = vmax.f32 %v442_v44, 0.0 }
 0x12f   : > { %v447_v47 = vpop.f32.mrb[6].mxu0  ;;  %831 = vmatprep.subr.bf16.mxu1 %v830_v43  ;;  %v457_v53 = vmax.f32 %v444_v46, 0.0 }
 0x130   : > { %v448_v48 = vadd.f32 %v447_v47, %v348_v45  ;;  %v449_v49 = vpop.f32.mrb[7].mxu0  ;;  %833 = vmatpush1.bf16.msra.mxu1 %v832_v42 }
 0x131   : > { %v450_v50 = vadd.f32 %v449_v49, %v348_v45 }
 0x132   : > { %v458_v52 = vmax.f32 %v448_v48, 0.0 }
 0x133   : > { %v459_v54 = vmax.f32 %v450_v50, 0.0 }
 0x134   : > { %v836_v55 = vpack.c.bf16 %v458_v52, %v456_v51 }
 0x135   : > { %v834_v56 = vpack.c.bf16 %v459_v54, %v457_v53 }
 0x137   : > { %835 = vmatprep.subr.bf16.mxu1 %v834_v56 }
 0x138   : > { %837 = vmatpush1.bf16.msra.mxu1 %v836_v55 }
 0x13b   : > { %805 = vmatmul.mubr.msk.f32.vlgmr.msra.gmra.mrb[0].mxu1 %vm350_vm0, %v460_v57 }
 0x13c   : > { %550 = vmatprep.mubr.f32.mxu1 %v994_v0 }
 0x13f   : > { %806 = vmatmul.mubr.msk.f32.gmra.mrb[2].mxu1 %vm350_vm0, %v461_v58 }
 0x140   : > { %636 = vmatprep.mubr.f32.mxu1 %v994_v0  ;;  %v561_v0 = vld [vmem:[%s1272_s5] sm:$0x3] }
 0x20e   : > { %v546_v59 = vpop.f32.mrb[0].mxu1 }
 0x20f   : > { %v548_v60 = vpop.f32.mrb[1].mxu1  ;;  %v547_v62 = vadd.f32 %v546_v59, %v467_v61 }
 0x210   : > { %v549_v1 = vadd.f32 %v548_v60, %v467_v61 }
 0x211   : > { %v557_v6 = vmax.f32 %v547_v62, 0.0 }
 0x212   : > { %v552_v2 = vpop.f32.mrb[2].mxu1  ;;  %v558_v8 = vmax.f32 %v549_v1, 0.0 }
 0x213   : > { %v553_v3 = vadd.f32 %v552_v2, %v472_v63  ;;  %v554_v4 = vpop.f32.mrb[3].mxu1 }
 0x214   : > { %v555_v5 = vadd.f32 %v554_v4, %v472_v63 }
 0x215   : > { %v559_v7 = vmax.f32 %v553_v3, 0.0 }
 0x216   : > { %v560_v9 = vmax.f32 %v555_v5, 0.0 }
 0x217   : > { %v840_v10 = vpack.c.bf16 %v559_v7, %v557_v6 }
 0x218   : > { %v838_v11 = vpack.c.bf16 %v560_v9, %v558_v8 }
 0x21a   : > { %839 = vmatprep.subr.bf16.mxu1 %v838_v11 }
 0x21b   : > { %841 = vmatpush1.bf16.msra.mxu1 %v840_v10 }
 0x21e   : > { %807 = vmatmul.mubr.msk.f32.vlgmr.msra.gmra.mrb[4].mxu1 %vm568_vm1, %v561_v0 }
 0x2f1   : > { %v638_v13 = vpop.f32.mrb[4].mxu1 }
 0x2f2   : > { %v639_v14 = vadd.f32 %v638_v13, %v566_v12  ;;  %v640_v15 = vpop.f32.mrb[5].mxu1 }
 0x2f3   : > { %v641_v16 = vadd.f32 %v640_v15, %v566_v12 }
 0x2f4   : > { %v644_v17 = vsel %vm643_vm2, %v639_v14, -inf }
 0x2f5   : > { %v645_v18 = vrot.slane %v644_v17, 4  ;;  %v651_v19 = vsel %vm643_vm2, %v641_v16, -inf }
 0x2f6   : > { %v652_v20 = vrot.slane %v651_v19, 4 }
 0x2f7   : > { %v646_v21 = vmax.f32 %v644_v17, %v645_v18 }
 0x2f8   : > { %v653_v22 = vmax.f32 %v651_v19, %v652_v20 }
 0x2f9   : > { %v647_v23 = vrot.slane %v646_v21, 2 }
 0x2fa   : > { %v654_v24 = vrot.slane %v653_v22, 2 }
 0x2fb   : > { %v648_v25 = vmax.f32 %v646_v21, %v647_v23 }
 0x2fc   : > { %v655_v26 = vmax.f32 %v653_v22, %v654_v24 }
 0x2fd   : > { %v649_v27 = vrot.slane %v648_v25, 1 }
 0x2fe   : > { %v656_v28 = vrot.slane %v655_v26, 1 }
 0x2ff   : > { %v650_v29 = vmax.f32 %v648_v25, %v649_v27 }
 0x300   : > { %v657_v30 = vmax.f32 %v655_v26, %v656_v28 }
 0x301   : > { %v658_v31 = vsub.f32 %v639_v14, %v650_v29 }
 0x302   : > { %v659_v32 = vsub.f32 %v641_v16, %v657_v30 }
 0x303   : > { %v660_v33 = vmul.f32 1.442695, %v658_v31 }
 0x304   : > { %v662_v34 = vmul.f32 1.442695, %v659_v32 }
 0x305   : > { %887 = vpow2.f32 %v660_v33 }
 0x306   : > { %889 = vpow2.f32 %v662_v34 }
 0x30f   : > { %v888_v35 = vpop.eup %887 }
 0x310   : > { %v890_v36 = vpop.eup %889  ;;  %v664_v37 = vsel %vm643_vm2, %v888_v35, 0.0 }
 0x311   : > { %v665_v38 = vrot.slane %v664_v37, 4  ;;  %v671_v39 = vsel %vm643_vm2, %v890_v36, 0.0 }
 0x312   : > { %v672_v40 = vrot.slane %v671_v39, 4 }
 0x313   : > { %v666_v41 = vadd.f32 %v665_v38, %v664_v37 }
 0x314   : > { %v673_v42 = vadd.f32 %v672_v40, %v671_v39 }
 0x315   : > { %v667_v43 = vrot.slane %v666_v41, 2 }
 0x316   : > { %v674_v44 = vrot.slane %v673_v42, 2 }
 0x317   : > { %v668_v45 = vadd.f32 %v667_v43, %v666_v41 }
 0x318   : > { %v675_v46 = vadd.f32 %v674_v44, %v673_v42 }
 0x319   : > { %v669_v47 = vrot.slane %v668_v45, 1 }
 0x31a   : > { %v676_v48 = vrot.slane %v675_v46, 1 }
 0x31b   : > { %v670_v49 = vadd.f32 %v669_v47, %v668_v45 }
 0x31c   : > { %v677_v50 = vadd.f32 %v676_v48, %v675_v46 }
 0x31d   : > { %891 = vlog2.f32 %v670_v49 }
 0x31e   : > { %893 = vlog2.f32 %v677_v50 }
 0x327   : > { %v892_v51 = vpop.eup %891 }
 0x328   : > { %v894_v52 = vpop.eup %893  ;;  %v679_v53 = vmul.f32 0.6931472, %v892_v51 }
 0x329   : > { %v681_v54 = vmul.f32 0.6931472, %v894_v52  ;;  %703 = sbr.rel (!%p1081_p9) target bundleno = 843 (0x34b), region = 56 }
 0x32a   : > { %v682_v55 = vsub.f32 %v658_v31, %v679_v53 }
 0x32b   : > { %v683_v56 = vsub.f32 %v659_v32, %v681_v54 }
 0x32d   : > { %v686_v57 = vcombine.low %v682_v55, %v683_v56 }
 0x32f   : > { %808 = vst.sshfl [vmem:[%s303_s17] sm:$0x33 pattern:$0x76325410] %v686_v57 }
 0x330   : > { %s1290_s8 = smov (!%p706_p6, %s705_s8), 2 }
 0x331   : > { %s1215_s9 = sshll.u32 %s1290_s8, 5 }
 0x332   : > { %s710_s14 = ssub.s32 64, %s1215_s9 }
 0x333   : > { %711 = vsyncadd %s697_s18, %s710_s14  ;;  %p812_p11 = scmp.ne.s32.totalorder %s1215_s9, 0  ;;  %s821_s16 = sshll.u32 %s1058_s28, 6 }
 0x334   : > { %s1225_s10 = scalar_lea.hbm %s1274_s7, %s821_s16  ;;  %s717_s15 = sshll.u32 %s303_s17, 4  ;;  %s718_s15 = int_to_ptr.vmem [resolvable:$true] %s717_s15 }
 0x335   : > { %s923_s22 = scalar_lea.vmem %s718_s15, %s1215_s9  ;;  %s996_s21 = smov [#allocation5]  }
 0x336   : > { %p924_p9 = scmp.ne.s32.totalorder %s718_s15, %s923_s22  ;;  %s927_s29 = sshll.u32 %s996_s21, 4  ;;  %s928_s29 = int_to_ptr.vmem [resolvable:$false] %s927_s29 }
 0x337   : > { %s929_s11 = scalar_lea.vmem %s928_s29, 128  ;;  %p930_p12 = scmp.lt.s32.totalorder %s718_s15, %s928_s29 }
 0x338   : > { %p925_p13 = pnand %p924_p9, %p812_p11  ;;  %p931_p0 = scmp.lt.s32.totalorder %s929_s11, %s923_s22 }
 0x33a   : > { %p926_p8 = pneg %p925_p13  ;;  %p932_p1 = por %p931_p0, %p930_p12 }
 0x33c   : > { %p933_p3 = pnand %p932_p1, %p926_p8 }
 0x33e   : > { %936 = shalt.err (!%p933_p3)
}
 0x33f   : > { %s937_s28 = scalar_lea.hbm %s1225_s10, %s1215_s9  ;;  %s941_s8 = scalar_lea.hbm %s1274_s7, 96 }
 0x340   : > { %p938_p4 = scmp.ne.s32.totalorder %s1225_s10, %s937_s28  ;;  %p942_p7 = scmp.lt.u32.totalorder %s1225_s10, %s1274_s7 }
 0x341   : > { %p943_p10 = scmp.lt.u32.totalorder %s941_s8, %s937_s28  ;;  %p945_p9 = scmp.lt.u32.totalorder %s937_s28, %s1225_s10 }
 0x342   : > { %p939_p5 = pnand %p938_p4, %p812_p11 }
 0x343   : > { %p944_p6 = por %p943_p10, %p942_p7 }
 0x344   : > { %p940_p2 = pneg %p939_p5 }
 0x345   : > { %p946_p13 = por %p945_p9, %p944_p6 }
 0x347   : > { %p947_p8 = pnand %p946_p13, %p940_p2 }
 0x349   : > { %950 = shalt.err (!%p947_p8)
}
 0x34a   : > { %720 = dma.vmem_to_hbm [thread:$0]  (%p812_p11), %s718_s15, %s1215_s9, %s1225_s10, %s697_s18  }
 0x34b PF: > { %s729_s12 = sand.u32 1, %s977_s24   ;;  %p1280_p12 = scmp.ne.s32.totalorder %s1279_s13, 0 }
 0x34c   : > { %p1281_p0 = scmp.ge.s32.totalorder %s989_s27, 2  ;;  %s730_s19 = scalar_lea.sflag [#allocation4], %s729_s12 }
 0x34e   : > { %p845_p1 = pnand %p1281_p0, %p1280_p12 }
 0x350   : > { %972 = dma.done.wait (!%p845_p1), %s730_s19, 64  }
 0x351   : > { %974 = vsyncadd (!%p845_p1), %s730_s19, 4294967232  ;;  %s1282_s22 = sld [smem:[#allocation8_spill]]  ;;  %p20_p3 = scmp.ge.s32.totalorder %s1062_s30, 4  }
 0x352   : > { %s1283_s24 = smov %s981_s25  ;;  %s1284_s25 = smov %s985_s26 }
 0x353   : > { %s1286_s27 = smov %s1062_s30  ;;  %22 = sbr.rel (!%p20_p3) target bundleno = 5 (0x5), region = 93 }
 0x357   : > { %s1285_s26 = smov %s1282_s22 }
 0x35a   :  { %735 = vsyncpa [#allocation3], 1 }
 0x35b   :  { %737 = vsyncpa [#allocation3 + $0x1], 1 }
 0x35c   :  { %738 = vsyncpa [#allocation4], 1 }
 0x35d   :  { %740 = vsyncpa [#allocation4 + $0x1], 1 }

</bundles_post_ra>
